<compile_context>
chip_gen: v7x
topology: tpu7x:2x2x1
jax: 0.10.0
libtpu: 0.0.40
codegen_flags: <defaults>
</compile_context>

<pallas_src>
import math

import jax
import jax.numpy as jnp
from jax.experimental import pallas as pl
from jax.experimental.pallas import tpu as pltpu


def _round_up(x, m):
    return ((x + m - 1) // m) * m


def _pad2(x, rows, cols):
    return jnp.pad(x, ((0, rows - x.shape[0]), (0, cols - x.shape[1])))


# ----------------------------------------------------------------------------
# Kernel 1:  Z[i] = relu( (sum_k A[i,k] @ X[k]) @ W1 + b1 ) @ W2
# ----------------------------------------------------------------------------
def _make_layer1_kernel(resident_x, tile_k):
    def kernel(a_ref, x_ref, w1_ref, b1_ref, w2_ref, z_ref, acc_ref):
        k = pl.program_id(1)

        @pl.when(k == 0)
        def _():
            acc_ref[...] = jnp.zeros_like(acc_ref)

        if resident_x:
            # X is fully VMEM-resident (constant-index BlockSpec): slice the k-th
            # row block out of the resident buffer instead of re-streaming it.
            start = pl.multiple_of(k * tile_k, tile_k)
            x_blk = x_ref[pl.ds(start, tile_k), :]
        else:
            x_blk = x_ref[...]

        # Aggregate on the (narrow) input-feature axis: acc += A[i, k] @ X[k].
        acc_ref[...] += jnp.dot(a_ref[...], x_blk,
                                preferred_element_type=jnp.float32)

        @pl.when(k == pl.num_programs(1) - 1)
        def _():
            h = jnp.dot(acc_ref[...].astype(w1_ref.dtype), w1_ref[...],
                        preferred_element_type=jnp.float32) + b1_ref[...]
            h = jnp.maximum(h, 0.0)
            z = jnp.dot(h.astype(w2_ref.dtype), w2_ref[...],
                        preferred_element_type=jnp.float32)
            z_ref[...] = z.astype(z_ref.dtype)

    return kernel


# ----------------------------------------------------------------------------
# Kernel 2:  Y[i] = (sum_k A[i,k] @ Z[k]) + b2
# ----------------------------------------------------------------------------
def _make_layer2_kernel(resident_z, tile_k):
    def kernel(a_ref, z_ref, b2_ref, o_ref, acc_ref):
        k = pl.program_id(1)

        @pl.when(k == 0)
        def _():
            acc_ref[...] = jnp.zeros_like(acc_ref)

        if resident_z:
            start = pl.multiple_of(k * tile_k, tile_k)
            z_blk = z_ref[pl.ds(start, tile_k), :]
        else:
            z_blk = z_ref[...]

        acc_ref[...] += jnp.dot(a_ref[...], z_blk,
                                preferred_element_type=jnp.float32)

        @pl.when(k == pl.num_programs(1) - 1)
        def _():
            o_ref[...] = (acc_ref[...] + b2_ref[...]).astype(o_ref.dtype)

    return kernel


def gcn_block2(a_hat, x, w1, b1, w2, b2, *, compute_dtype=jnp.bfloat16,
               tile_n=1024, tile_k=2048,
               resident_limit_bytes=8 * 1024 * 1024,
               vmem_limit_bytes=48 * 1024 * 1024):
    """Y = A_hat @ relu(A_hat @ X @ W1 + b1) @ W2 + b2, returned as f32 (N, F_out)."""
    n = x.shape[0]
    f_in, f_hid = w1.shape
    f_out = w2.shape[1]

    lane = 128

    # Clamp tiles for small graphs so we don't do quadratic padded-A work.
    n_min = _round_up(n, lane)
    tile_n = min(tile_n, n_min)
    tile_k = min(tile_k, n_min)

    # Pad n to a multiple of lcm(tile_n, tile_k) so BOTH grid axes divide exactly
    # (rounding to max(tile_n, tile_k) silently drops row tiles when tile_n does
    # not divide it).
    n_pad = _round_up(n, math.lcm(tile_n, tile_k))

    # v7x has 2 TensorCores; the parallel row axis is what gets sharded across
    # them, so prefer at least 2 row tiles when there is room.
    if n_pad // tile_n == 1 and n_pad >= 2 * lane:
        tile_n = n_pad // 2   # still a multiple of 64 >= 128/2, divides n_pad exactly

    f_in_p = _round_up(f_in, lane)
    f_hid_p = _round_up(f_hid, lane)
    f_out_p = _round_up(f_out, lane)

    itemsize = jnp.dtype(compute_dtype).itemsize
    resident_x = n_pad * f_in_p * itemsize <= resident_limit_bytes
    resident_z = n_pad * f_out_p * itemsize <= resident_limit_bytes

    # Zero-pad to lane-dense / tile-aligned shapes; padded rows/cols contribute
    # nothing to the real outputs and are sliced away at the end.
    a_p = _pad2(a_hat, n_pad, n_pad).astype(compute_dtype)
    x_p = _pad2(x, n_pad, f_in_p).astype(compute_dtype)
    w1_p = _pad2(w1, f_in_p, f_hid_p).astype(compute_dtype)
    b1_p = _pad2(b1, 1, f_hid_p).astype(jnp.float32)
    w2_p = _pad2(w2, f_hid_p, f_out_p).astype(compute_dtype)
    b2_p = _pad2(b2, 1, f_out_p).astype(jnp.float32)

    grid = (n_pad // tile_n, n_pad // tile_k)
    compiler_params = pltpu.CompilerParams(
        dimension_semantics=("parallel", "arbitrary"),
        vmem_limit_bytes=vmem_limit_bytes,
    )

    # Layer 1 (+ fused layer-2 feature transform): Z = relu(A X W1 + b1) W2
    if resident_x:
        x_spec = pl.BlockSpec((n_pad, f_in_p), lambda i, k: (0, 0))     # X resident
    else:
        x_spec = pl.BlockSpec((tile_k, f_in_p), lambda i, k: (k, 0))    # X streamed

    z = pl.pallas_call(
        _make_layer1_kernel(resident_x, tile_k),
        out_shape=jax.ShapeDtypeStruct((n_pad, f_out_p), compute_dtype),
        grid_spec=pltpu.PrefetchScalarGridSpec(
            num_scalar_prefetch=0,
            grid=grid,
            in_specs=[
                pl.BlockSpec((tile_n, tile_k), lambda i, k: (i, k)),    # A_hat tile
                x_spec,
                pl.BlockSpec((f_in_p, f_hid_p), lambda i, k: (0, 0)),   # W1 (resident)
                pl.BlockSpec((1, f_hid_p), lambda i, k: (0, 0)),        # b1 (resident)
                pl.BlockSpec((f_hid_p, f_out_p), lambda i, k: (0, 0)),  # W2 (resident)
            ],
            out_specs=pl.BlockSpec((tile_n, f_out_p), lambda i, k: (i, 0)),
            scratch_shapes=[pltpu.VMEM((tile_n, f_in_p), jnp.float32)],
        ),
        compiler_params=compiler_params,
    )(a_p, x_p, w1_p, b1_p, w2_p)

    # Layer 2 aggregation: Y = A Z + b2
    if resident_z:
        z_spec = pl.BlockSpec((n_pad, f_out_p), lambda i, k: (0, 0))    # Z resident
    else:
        z_spec = pl.BlockSpec((tile_k, f_out_p), lambda i, k: (k, 0))   # Z streamed

    y = pl.pallas_call(
        _make_layer2_kernel(resident_z, tile_k),
        out_shape=jax.ShapeDtypeStruct((n_pad, f_out_p), jnp.float32),
        grid_spec=pltpu.PrefetchScalarGridSpec(
            num_scalar_prefetch=0,
            grid=grid,
            in_specs=[
                pl.BlockSpec((tile_n, tile_k), lambda i, k: (i, k)),    # A_hat tile
                z_spec,
                pl.BlockSpec((1, f_out_p), lambda i, k: (0, 0)),        # b2 (resident)
            ],
            out_specs=pl.BlockSpec((tile_n, f_out_p), lambda i, k: (i, 0)),
            scratch_shapes=[pltpu.VMEM((tile_n, f_out_p), jnp.float32)],
        ),
        compiler_params=compiler_params,
    )(a_p, z, b2_p)

    return y[:n, :f_out]


def build_normalized_adjacency(key, n_nodes, p_edge=0.3):
    """Synthetic undirected graph (with self-loops so no zero-degree nodes),
    normalized the DGL 'both' way: A_hat = D^{-1/2} A D^{-1/2}."""
    upper = (jax.random.uniform(key, (n_nodes, n_nodes)) < p_edge).astype(jnp.float32)
    upper = jnp.triu(upper, k=1)
    adj = upper + upper.T + jnp.eye(n_nodes, dtype=jnp.float32)
    deg = adj.sum(axis=1)
    d_inv_sqrt = 1.0 / jnp.sqrt(deg)
    return adj * d_inv_sqrt[:, None] * d_inv_sqrt[None, :]


def reference_gcn_block2(a_hat, x, w1, b1, w2, b2):
    h = a_hat @ (x @ w1) + b1
    h = jnp.maximum(h, 0.0)
    return a_hat @ (h @ w2) + b2


def _make_inputs(key, n, f_in, f_hid, f_out):
    k_graph, k_x, k_w1, k_b1, k_w2, k_b2 = jax.random.split(key, 6)
    a_hat = build_normalized_adjacency(k_graph, n)
    x = jax.random.normal(k_x, (n, f_in), dtype=jnp.float32)
    w1 = jax.random.normal(k_w1, (f_in, f_hid), dtype=jnp.float32) * (1.0 / jnp.sqrt(f_in))
    b1 = jax.random.normal(k_b1, (1, f_hid), dtype=jnp.float32) * 0.01
    w2 = jax.random.normal(k_w2, (f_hid, f_out), dtype=jnp.float32) * (1.0 / jnp.sqrt(f_hid))
    b2 = jax.random.normal(k_b2, (1, f_out), dtype=jnp.float32) * 0.01
    return a_hat, x, w1, b1, w2, b2


if __name__ == "__main__":
    key = jax.random.PRNGKey(0)
    k_small, k_med = jax.random.split(key)

    # ---- Small shapes consistent with the module: N nodes, in/hid/out dims ----
    N, IN_FEATS, HID_FEATS, OUT_FEATS = 16, 8, 32, 16
    args = _make_inputs(k_small, N, IN_FEATS, HID_FEATS, OUT_FEATS)
    ref = reference_gcn_block2(*args)

    # f32 path: exact check (tiles auto-clamped for the tiny graph).
    out_f32 = gcn_block2(*args, compute_dtype=jnp.float32)
    jax.block_until_ready(out_f32)
    assert out_f32.shape == (N, OUT_FEATS)
    assert jnp.allclose(out_f32, ref, atol=1e-4, rtol=1e-4)

    # bf16 MXU path (f32 accumulation): looser tolerance.
    out_bf16 = gcn_block2(*args, compute_dtype=jnp.bfloat16)
    jax.block_until_ready(out_bf16)
    assert out_bf16.shape == (N, OUT_FEATS)
    assert jnp.allclose(out_bf16, ref, atol=5e-2, rtol=5e-2)

    # ---- Medium graph to exercise multi-tile reduction, the even-row-tile split,
    #      and both the VMEM-resident and streamed X/Z paths -------------------
    NM = 600
    args_m = _make_inputs(k_med, NM, IN_FEATS, HID_FEATS, OUT_FEATS)
    ref_m = reference_gcn_block2(*args_m)

    out_res = gcn_block2(*args_m, compute_dtype=jnp.float32, tile_n=128, tile_k=256)
    jax.block_until_ready(out_res)
    assert out_res.shape == (NM, OUT_FEATS)
    assert jnp.allclose(out_res, ref_m, atol=2e-3, rtol=2e-3)

    out_stream = gcn_block2(*args_m, compute_dtype=jnp.float32, tile_n=128, tile_k=256,
                            resident_limit_bytes=0)  # force streamed X/Z path
    jax.block_until_ready(out_stream)
    assert out_stream.shape == (NM, OUT_FEATS)
    assert jnp.allclose(out_stream, ref_m, atol=2e-3, rtol=2e-3)

    print("KERNEL_OK")
</pallas_src>

<mosaic_0001>
module attributes {stable_mosaic.version = 11 : i64} {
  func.func @kernel(%arg0: i32, %arg1: i32, %arg2: memref<128x128xf32, #tpu.memory_space<vmem>>, %arg3: memref<128x128xf32, #tpu.memory_space<vmem>>, %arg4: memref<128x128xf32, #tpu.memory_space<vmem>>, %arg5: memref<1x128xf32, #tpu.memory_space<vmem>>, %arg6: memref<128x128xf32, #tpu.memory_space<vmem>>, %arg7: memref<128x128xf32, #tpu.memory_space<vmem>>, %arg8: memref<128x128xf32, #tpu.memory_space<vmem>>) attributes {dimension_semantics = [#tpu.dimension_semantics<parallel>, #tpu.dimension_semantics<arbitrary>], iteration_bounds = array<i64: 1, 1>, scalar_prefetch = 0 : i64, scratch_operands = 1 : i64, tpu.core_type = #tpu.core_type<tc>, window_params = [{transform_indices = @transform_0, window_bounds = array<i64: 128, 128>}, {pipeline_mode = #tpu.pipeline_mode<synchronous>, transform_indices = @transform_1, window_bounds = array<i64: 128, 128>}, {pipeline_mode = #tpu.pipeline_mode<synchronous>, transform_indices = @transform_2, window_bounds = array<i64: 128, 128>}, {pipeline_mode = #tpu.pipeline_mode<synchronous>, transform_indices = @transform_3, window_bounds = array<i64: 1, 128>}, {pipeline_mode = #tpu.pipeline_mode<synchronous>, transform_indices = @transform_4, window_bounds = array<i64: 128, 128>}, {transform_indices = @transform_5, window_bounds = array<i64: 128, 128>}]} {
    %c0_i32 = arith.constant 0 : i32
    %0 = arith.cmpi eq, %arg1, %c0_i32 : i32
    %1 = arith.extui %0 : i1 to i32
    %c0_i32_0 = arith.constant 0 : i32
    %2 = arith.cmpi ne, %1, %c0_i32_0 : i32
    scf.if %2 {
      %cst_9 = arith.constant 0.000000e+00 : f32
      %15 = vector.broadcast %cst_9 : f32 to vector<128x128xf32>
      %c0_10 = arith.constant 0 : index
      %c0_11 = arith.constant 0 : index
      %16 = vector.load %arg8[%c0_10, %c0_11] : memref<128x128xf32, #tpu.memory_space<vmem>>, vector<128x128xf32>
      tpu.vector_store %arg8[%c0_10, %c0_11], %15 {strides = array<i32>} : memref<128x128xf32, #tpu.memory_space<vmem>>, vector<128x128xf32>,
    } else {
    }
    %c128_i32 = arith.constant 128 : i32
    %3 = arith.muli %arg1, %c128_i32 : i32
    %4 = tpu.assume_multiple %3, 128 : i32
    %5 = arith.index_cast %4 : i32 to index
    %c0 = arith.constant 0 : index
    %6 = vector.load %arg3[%5, %c0] : memref<128x128xf32, #tpu.memory_space<vmem>>, vector<128x128xf32>
    %c0_1 = arith.constant 0 : index
    %c0_2 = arith.constant 0 : index
    %7 = vector.load %arg8[%c0_1, %c0_2] : memref<128x128xf32, #tpu.memory_space<vmem>>, vector<128x128xf32>
    %c0_3 = arith.constant 0 : index
    %c0_4 = arith.constant 0 : index
    %8 = vector.load %arg2[%c0_3, %c0_4] : memref<128x128xf32, #tpu.memory_space<vmem>>, vector<128x128xf32>
    %cst = arith.constant dense<0.000000e+00> : vector<128x128xf32>
    %9 = tpu.matmul %8, %6, %cst {dimension_numbers = #tpu.dot_dimension_numbers<[1], [0], [0], [1], [0, 0, 1, 1], [], []>} : vector<128x128xf32>, vector<128x128xf32>, vector<128x128xf32> -> vector<128x128xf32>
    %10 = arith.addf %7, %9 : vector<128x128xf32>
    %c0_5 = arith.constant 0 : index
    %c0_6 = arith.constant 0 : index
    %11 = vector.load %arg8[%c0_5, %c0_6] : memref<128x128xf32, #tpu.memory_space<vmem>>, vector<128x128xf32>
    tpu.vector_store %arg8[%c0_5, %c0_6], %10 {strides = array<i32>} : memref<128x128xf32, #tpu.memory_space<vmem>>, vector<128x128xf32>,
    %c0_i32_7 = arith.constant 0 : i32
    %12 = arith.cmpi eq, %arg1, %c0_i32_7 : i32
    %13 = arith.extui %12 : i1 to i32
    %c0_i32_8 = arith.constant 0 : i32
    %14 = arith.cmpi ne, %13, %c0_i32_8 : i32
    scf.if %14 {
      %c0_9 = arith.constant 0 : index
      %c0_10 = arith.constant 0 : index
      %15 = vector.load %arg8[%c0_9, %c0_10] : memref<128x128xf32, #tpu.memory_space<vmem>>, vector<128x128xf32>
      %c0_11 = arith.constant 0 : index
      %c0_12 = arith.constant 0 : index
      %16 = vector.load %arg4[%c0_11, %c0_12] : memref<128x128xf32, #tpu.memory_space<vmem>>, vector<128x128xf32>
      %cst_13 = arith.constant dense<0.000000e+00> : vector<128x128xf32>
      %17 = tpu.matmul %15, %16, %cst_13 {dimension_numbers = #tpu.dot_dimension_numbers<[1], [0], [0], [1], [0, 0, 1, 1], [], []>} : vector<128x128xf32>, vector<128x128xf32>, vector<128x128xf32> -> vector<128x128xf32>
      %c0_14 = arith.constant 0 : index
      %c0_15 = arith.constant 0 : index
      %18 = vector.load %arg5[%c0_14, %c0_15] : memref<1x128xf32, #tpu.memory_space<vmem>>, vector<1x128xf32>
      %19 = vector.broadcast %18 : vector<1x128xf32> to vector<128x128xf32>
      %20 = arith.addf %17, %19 : vector<128x128xf32>
      %cst_16 = arith.constant 0.000000e+00 : f32
      %21 = vector.broadcast %cst_16 : f32 to vector<128x128xf32>
      %22 = arith.maximumf %20, %21 : vector<128x128xf32>
      %c0_17 = arith.constant 0 : index
      %c0_18 = arith.constant 0 : index
      %23 = vector.load %arg6[%c0_17, %c0_18] : memref<128x128xf32, #tpu.memory_space<vmem>>, vector<128x128xf32>
      %cst_19 = arith.constant dense<0.000000e+00> : vector<128x128xf32>
      %24 = tpu.matmul %22, %23, %cst_19 {dimension_numbers = #tpu.dot_dimension_numbers<[1], [0], [0], [1], [0, 0, 1, 1], [], []>} : vector<128x128xf32>, vector<128x128xf32>, vector<128x128xf32> -> vector<128x128xf32>
      %c0_20 = arith.constant 0 : index
      %c0_21 = arith.constant 0 : index
      %25 = vector.load %arg7[%c0_20, %c0_21] : memref<128x128xf32, #tpu.memory_space<vmem>>, vector<128x128xf32>
      tpu.vector_store %arg7[%c0_20, %c0_21], %24 {strides = array<i32>} : memref<128x128xf32, #tpu.memory_space<vmem>>, vector<128x128xf32>,
    } else {
    }
    return
  }
  func.func @transform_0(%arg0: i32, %arg1: i32) -> (i32, i32) {
    %c0_i32 = arith.constant 0 : i32
    return %arg0, %arg1 : i32, i32
  }
  func.func @transform_1(%arg0: i32, %arg1: i32) -> (i32, i32) {
    %c0_i32 = arith.constant 0 : i32
    %c0_i32_0 = arith.constant 0 : i32
    %c0_i32_1 = arith.constant 0 : i32
    return %c0_i32, %c0_i32_0 : i32, i32
  }
  func.func @transform_2(%arg0: i32, %arg1: i32) -> (i32, i32) {
    %c0_i32 = arith.constant 0 : i32
    %c0_i32_0 = arith.constant 0 : i32
    %c0_i32_1 = arith.constant 0 : i32
    return %c0_i32, %c0_i32_0 : i32, i32
  }
  func.func @transform_3(%arg0: i32, %arg1: i32) -> (i32, i32) {
    %c0_i32 = arith.constant 0 : i32
    %c0_i32_0 = arith.constant 0 : i32
    %c0_i32_1 = arith.constant 0 : i32
    return %c0_i32, %c0_i32_0 : i32, i32
  }
  func.func @transform_4(%arg0: i32, %arg1: i32) -> (i32, i32) {
    %c0_i32 = arith.constant 0 : i32
    %c0_i32_0 = arith.constant 0 : i32
    %c0_i32_1 = arith.constant 0 : i32
    return %c0_i32, %c0_i32_0 : i32, i32
  }
  func.func @transform_5(%arg0: i32, %arg1: i32) -> (i32, i32) {
    %c0_i32 = arith.constant 0 : i32
    %c0_i32_0 = arith.constant 0 : i32
    return %arg0, %c0_i32 : i32, i32
  }
}

</mosaic_0001>

<bundles_post_ra>
// kernel: tpu_custom_call.1
= control target key start
LH: loop header
LB: loop body
LE: loop exit
PB: predicated region body
PF: predicated region fallthrough
CT: control target
= control target key end

     0   :  { %10 = vsyncpa [#allocation4], 0  ;;  %s1353_s0 = inlined_call_operand.hbm [shape: f32[128,128], index: 0, kind: input, shape index: {}]   ;;  %s1354_s1 = inlined_call_operand.hbm [shape: f32[128,128], index: 1, kind: input, shape index: {}]   ;;  %s1355_s2 = inlined_call_operand.hbm [shape: f32[128,128], index: 2, kind: input, shape index: {}]   ;;  %s1356_s3 = inlined_call_operand.vmem [shape: f32[1,128], index: 3, kind: input, shape index: {}]   ;;  %s1357_s4 = inlined_call_operand.hbm [shape: f32[128,128], index: 4, kind: input, shape index: {}]   ;;  %s1358_s5 = inlined_call_operand.hbm [shape: f32[128,128], index: 5, kind: output, shape index: {}]  }
   0x1   :  { %11 = vsyncpa [#allocation7], 0 }
   0x2   :  { %12 = vsyncpa [#allocation10], 0 }
   0x3   :  { %13 = vsyncpa [#allocation5], 0  ;;  %s1224_s18 = smov [#allocation6]   ;;  %s1225_s20 = smov [#allocation3]  }
   0x4   :  { %s31_s19 = sshll.u32 %s1224_s18, 4  ;;  %s19_s21 = sshll.u32 %s1225_s20, 4  ;;  %s32_s19 = int_to_ptr.vmem [resolvable:$true] %s31_s19  ;;  %s1261_s21 = int_to_ptr.vmem [resolvable:$true] %s19_s21 }
   0x5   :  { %s1106_s24 = scalar_lea.hbm %s1354_s1, 2048 }
   0x6   :  { %p1107_p0 = scmp.ne.s32.totalorder %s1354_s1, %s1106_s24  ;;  %p1110_p1 = scmp.lt.u32.totalorder %s1106_s24, %s1354_s1 }
   0x8   :  { %p1112_p2 = pnand %p1110_p1, %p1107_p0 }
   0xa   :  { %1115 = shalt.err (!%p1112_p2)
}
   0xb   :  { %s1116_s29 = scalar_lea.vmem %s32_s19, 2048  ;;  %p1121_p4 = scmp.lt.s32.totalorder %s32_s19, %s32_s19 }
   0xc   :  { %p1117_p3 = scmp.ne.s32.totalorder %s32_s19, %s1116_s29  ;;  %p1122_p5 = scmp.lt.s32.totalorder %s1116_s29, %s1116_s29 }
   0xe   :  { %p1123_p6 = por %p1122_p5, %p1121_p4 }
  0x10   :  { %p1124_p7 = pnand %p1123_p6, %p1117_p3 }
  0x12   :  { %1127 = shalt.err (!%p1124_p7)
}
  0x13   :  { %s1226_s30 = smov 128   ;;  %s1227_s6 = smov 8  }
  0x14   :  { %37 = dma.hbm_to_vmem [thread:$0]  %s1354_s1, 2048, %s32_s19, [#allocation7], %s1226_s30, %s1226_s30, %s1227_s6  }
  0x15   :  { %s1128_s11 = scalar_lea.hbm %s1353_s0, 2048 }
  0x16   :  { %p1129_p8 = scmp.ne.s32.totalorder %s1353_s0, %s1128_s11  ;;  %p1132_p9 = scmp.lt.u32.totalorder %s1128_s11, %s1353_s0 }
  0x18   :  { %p1134_p10 = pnand %p1132_p9, %p1129_p8 }
  0x1a   :  { %1137 = shalt.err (!%p1134_p10)
}
  0x1b   :  { %s1138_s16 = scalar_lea.vmem %s1261_s21, 2048  ;;  %p1143_p12 = scmp.lt.s32.totalorder %s1261_s21, %s1261_s21 }
  0x1c   :  { %p1139_p11 = scmp.ne.s32.totalorder %s1261_s21, %s1138_s16  ;;  %p1144_p13 = scmp.lt.s32.totalorder %s1138_s16, %s1138_s16 }
  0x1e   :  { %p1145_p0 = por %p1144_p13, %p1143_p12 }
  0x20   :  { %p1146_p1 = pnand %p1145_p0, %p1139_p11 }
  0x22   :  { %1149 = shalt.err (!%p1146_p1)
}
  0x23   :  { %25 = dma.hbm_to_vmem [thread:$0]  %s1353_s0, 2048, %s1261_s21, [#allocation4], %s1226_s30, %s1226_s30, %s1227_s6  }
  0x24   :  { %s1228_s18 = smov [#allocation8]   ;;  %s1229_s20 = smov [#allocation9]  }
  0x25   :  { %s43_s19 = sshll.u32 %s1228_s18, 4  ;;  %s57_s22 = sshll.u32 %s1229_s20, 4  ;;  %s44_s19 = int_to_ptr.vmem [resolvable:$true] %s43_s19  ;;  %s1298_s22 = int_to_ptr.vmem [resolvable:$true] %s57_s22 }
  0x26   :  { %s1150_s25 = scalar_lea.hbm %s1355_s2, 2048 }
  0x27   :  { %p1151_p2 = scmp.ne.s32.totalorder %s1355_s2, %s1150_s25  ;;  %p1154_p3 = scmp.lt.u32.totalorder %s1150_s25, %s1355_s2 }
  0x29   :  { %p1156_p4 = pnand %p1154_p3, %p1151_p2 }
  0x2b   :  { %1159 = shalt.err (!%p1156_p4)
}
  0x2c   :  { %s1160_s0 = scalar_lea.vmem %s44_s19, 2048  ;;  %p1165_p6 = scmp.lt.s32.totalorder %s44_s19, %s44_s19 }
  0x2d   :  { %p1161_p5 = scmp.ne.s32.totalorder %s44_s19, %s1160_s0  ;;  %p1166_p7 = scmp.lt.s32.totalorder %s1160_s0, %s1160_s0 }
  0x2f   :  { %p1167_p8 = por %p1166_p7, %p1165_p6 }
  0x31   :  { %p1168_p9 = pnand %p1167_p8, %p1161_p5 }
  0x33   :  { %1171 = shalt.err (!%p1168_p9)
}
  0x34   :  { %49 = dma.hbm_to_vmem [thread:$0]  %s1355_s2, 2048, %s44_s19, [#allocation7], %s1226_s30, %s1226_s30, %s1227_s6  }
  0x35   :  { %s1172_s10 = scalar_lea.hbm %s1357_s4, 2048 }
  0x36   :  { %p1173_p10 = scmp.ne.s32.totalorder %s1357_s4, %s1172_s10  ;;  %p1176_p11 = scmp.lt.u32.totalorder %s1172_s10, %s1357_s4 }
  0x38   :  { %p1178_p12 = pnand %p1176_p11, %p1173_p10 }
  0x3a   :  { %1181 = shalt.err (!%p1178_p12)
}
  0x3b   :  { %s1182_s15 = scalar_lea.vmem %s1298_s22, 2048  ;;  %p1187_p0 = scmp.lt.s32.totalorder %s1298_s22, %s1298_s22 }
  0x3c   :  { %p1183_p13 = scmp.ne.s32.totalorder %s1298_s22, %s1182_s15  ;;  %p1188_p1 = scmp.lt.s32.totalorder %s1182_s15, %s1182_s15 }
  0x3e   :  { %p1189_p2 = por %p1188_p1, %p1187_p0 }
  0x40   :  { %p1190_p3 = pnand %p1189_p2, %p1183_p13 }
  0x42   :  { %1193 = shalt.err (!%p1190_p3)
}
  0x43   :  { %63 = dma.hbm_to_vmem [thread:$0]  %s1357_s4, 2048, %s1298_s22, [#allocation10], %s1226_s30, %s1226_s30, %s1227_s6  }
  0x44   :  { %1216 = dma.done.wait [#allocation4], 2048  }
  0x45   :  { %1217 = vsyncadd [#allocation4], 4294965248 }
  0x46   :  { %1218 = dma.done.wait [#allocation7], 4096  }
  0x47   :  { %1219 = vsyncadd [#allocation7], 4294963200 }
  0x48   :  { %1220 = dma.done.wait [#allocation10], 2048  }
  0x49   :  { %1221 = vsyncadd [#allocation10], 4294965248  ;;  %v98_v0 = vld [vmem:[#allocation6] sm:$0xff]  ;;  %v99_v1 = vld [vmem:[#allocation6 + $0x8] sm:$0xff] }
  0x4a   :  { %v100_v2 = vld [vmem:[#allocation6 + $0x10] sm:$0xff]  ;;  %v987_v3 = vpack.c.bf16 %v99_v1, %v98_v0  ;;  %v101_v4 = vld [vmem:[#allocation6 + $0x18] sm:$0xff]  ;;  %v102_v6 = vld [vmem:[#allocation6 + $0x20] sm:$0xff] }
  0x4b   :  { %v991_v5 = vpack.c.bf16 %v101_v4, %v100_v2  ;;  %v103_v7 = vld [vmem:[#allocation6 + $0x28] sm:$0xff]  ;;  %v130_v9 = vld [vmem:[#allocation3] sm:$0xff]  ;;  %v104_v10 = vld [vmem:[#allocation6 + $0x30] sm:$0xff] }
  0x4c   :  { %988 = vmatprep.subr.bf16.mxu0 %v987_v3  ;;  %v995_v8 = vpack.c.bf16 %v103_v7, %v102_v6  ;;  %v105_v11 = vld [vmem:[#allocation6 + $0x38] sm:$0xff]  ;;  %851 = vmatprep.mubr.f32.mxu0 %v130_v9  ;;  %v106_v13 = vld [vmem:[#allocation6 + $0x40] sm:$0xff]  ;;  %v107_v14 = vld [vmem:[#allocation6 + $0x48] sm:$0xff] }
  0x4d   :  { %990 = vmatpush3.bf16.msra.mxu0 %v987_v3  ;;  %v999_v12 = vpack.c.bf16 %v105_v11, %v104_v10  ;;  %v342_v15 = vld [vmem:[#allocation8] sm:$0xff]  ;;  %v343_v16 = vld [vmem:[#allocation8 + $0x8] sm:$0xff]  ;;  %v344_v17 = vld [vmem:[#allocation8 + $0x10] sm:$0xff]  ;;  %v1003_v21 = vpack.c.bf16 %v107_v14, %v106_v13 }
  0x4e   :  { %992 = vmatprep.subr.bf16.mxu0 %v991_v5  ;;  %v345_v18 = vld [vmem:[#allocation8 + $0x18] sm:$0xff]  ;;  %v1019_v19 = vpack.c.bf16 %v343_v16, %v342_v15  ;;  %v346_v22 = vld [vmem:[#allocation8 + $0x20] sm:$0xff]  ;;  %v347_v23 = vld [vmem:[#allocation8 + $0x28] sm:$0xff] }
  0x4f   :  { %v1023_v20 = vpack.c.bf16 %v345_v18, %v344_v17  ;;  %v108_v24 = vld [vmem:[#allocation6 + $0x50] sm:$0xff]  ;;  %v109_v25 = vld [vmem:[#allocation6 + $0x58] sm:$0xff]  ;;  %v1027_v26 = vpack.c.bf16 %v347_v23, %v346_v22  ;;  %v110_v30 = vld [vmem:[#allocation6 + $0x60] sm:$0xff] }
  0x50   :  { %1020 = vmatprep.subr.bf16.mxu1 %v1019_v19  ;;  %v1007_v27 = vpack.c.bf16 %v109_v25, %v108_v24  ;;  %v348_v28 = vld [vmem:[#allocation8 + $0x30] sm:$0xff]  ;;  %v349_v29 = vld [vmem:[#allocation8 + $0x38] sm:$0xff]  ;;  %v111_v31 = vld [vmem:[#allocation6 + $0x68] sm:$0xff] }
  0x51   :  { %994 = vmatpush3.bf16.msra.mxu0 %v991_v5  ;;  %1022 = vmatpush3.bf16.msra.mxu1 %v1019_v19  ;;  %v1031_v32 = vpack.c.bf16 %v349_v29, %v348_v28  ;;  %v1011_v33 = vpack.c.bf16 %v111_v31, %v110_v30  ;;  %v350_v34 = vld [vmem:[#allocation8 + $0x40] sm:$0xff]  ;;  %v351_v35 = vld [vmem:[#allocation8 + $0x48] sm:$0xff]  ;;  %v112_v36 = vld [vmem:[#allocation6 + $0x70] sm:$0xff] }
  0x52   :  { %996 = vmatprep.subr.bf16.mxu0 %v995_v8  ;;  %1024 = vmatprep.subr.bf16.mxu1 %v1023_v20  ;;  %v113_v37 = vld [vmem:[#allocation6 + $0x78] sm:$0xff]  ;;  %v1035_v38 = vpack.c.bf16 %v351_v35, %v350_v34  ;;  %v352_v40 = vld [vmem:[#allocation8 + $0x50] sm:$0xff]  ;;  %v354_v43 = vld [vmem:[#allocation8 + $0x60] sm:$0xff] }
  0x53   :  { %v1015_v39 = vpack.c.bf16 %v113_v37, %v112_v36  ;;  %v353_v41 = vld [vmem:[#allocation8 + $0x58] sm:$0xff]  ;;  %v355_v44 = vld [vmem:[#allocation8 + $0x68] sm:$0xff]  ;;  %v132_v47 = vld [vmem:[#allocation3 + $0x10] sm:$0xff] }
  0x54   :  { %v1039_v42 = vpack.c.bf16 %v353_v41, %v352_v40  ;;  %v131_v45 = vld [vmem:[#allocation3 + $0x8] sm:$0xff]  ;;  %v1043_v46 = vpack.c.bf16 %v355_v44, %v354_v43  ;;  %v356_v48 = vld [vmem:[#allocation8 + $0x70] sm:$0xff]  ;;  %v357_v49 = vld [vmem:[#allocation8 + $0x78] sm:$0xff] }
  0x55   :  { %998 = vmatpush3.bf16.msra.mxu0 %v995_v8  ;;  %1026 = vmatpush3.bf16.msra.mxu1 %v1023_v20  ;;  %v133_v50 = vld [vmem:[#allocation3 + $0x18] sm:$0xff]  ;;  %v1047_v51 = vpack.c.bf16 %v357_v49, %v356_v48  ;;  %v134_v52 = vld [vmem:[#allocation3 + $0x20] sm:$0xff]  ;;  %v135_v53 = vld [vmem:[#allocation3 + $0x28] sm:$0xff] }
  0x56   :  { %1000 = vmatprep.subr.bf16.mxu0 %v999_v12  ;;  %1028 = vmatprep.subr.bf16.mxu1 %v1027_v26  ;;  %v136_v54 = vld [vmem:[#allocation3 + $0x30] sm:$0xff]  ;;  %v137_v55 = vld [vmem:[#allocation3 + $0x38] sm:$0xff]  ;;  %v138_v56 = vld [vmem:[#allocation3 + $0x40] sm:$0xff] }
  0x57   :  { %v139_v57 = vld [vmem:[#allocation3 + $0x48] sm:$0xff]  ;;  %v140_v58 = vld [vmem:[#allocation3 + $0x50] sm:$0xff]  ;;  %v141_v59 = vld [vmem:[#allocation3 + $0x58] sm:$0xff] }
  0x58   :  { %v142_v60 = vld [vmem:[#allocation3 + $0x60] sm:$0xff]  ;;  %v143_v61 = vld [vmem:[#allocation3 + $0x68] sm:$0xff]  ;;  %v144_v62 = vld [vmem:[#allocation3 + $0x70] sm:$0xff] }
  0x59   :  { %1002 = vmatpush3.bf16.msra.mxu0 %v999_v12  ;;  %1030 = vmatpush3.bf16.msra.mxu1 %v1027_v26  ;;  %v145_v63 = vld [vmem:[#allocation3 + $0x78] sm:$0xff]  ;;  %v526_v0 = vld [vmem:[#allocation9] sm:$0xff]  ;;  %v527_v1 = vld [vmem:[#allocation9 + $0x8] sm:$0xff] }
  0x5a   :  { %1004 = vmatprep.subr.bf16.mxu0 %v1003_v21  ;;  %1032 = vmatprep.subr.bf16.mxu1 %v1031_v32  ;;  %v528_v2 = vld [vmem:[#allocation9 + $0x10] sm:$0xff]  ;;  %v1051_v3 = vpack.c.bf16 %v527_v1, %v526_v0  ;;  %v529_v4 = vld [vmem:[#allocation9 + $0x18] sm:$0xff]  ;;  %v530_v6 = vld [vmem:[#allocation9 + $0x20] sm:$0xff] }
  0x5b   :  { %v1055_v5 = vpack.c.bf16 %v529_v4, %v528_v2  ;;  %v531_v7 = vld [vmem:[#allocation9 + $0x28] sm:$0xff]  ;;  %v532_v9 = vld [vmem:[#allocation9 + $0x30] sm:$0xff]  ;;  %v533_v10 = vld [vmem:[#allocation9 + $0x38] sm:$0xff] }
  0x5c   :  { %v1059_v8 = vpack.c.bf16 %v531_v7, %v530_v6  ;;  %v1063_v11 = vpack.c.bf16 %v533_v10, %v532_v9  ;;  %v534_v12 = vld [vmem:[#allocation9 + $0x40] sm:$0xff]  ;;  %v535_v13 = vld [vmem:[#allocation9 + $0x48] sm:$0xff]  ;;  %v536_v15 = vld [vmem:[#allocation9 + $0x50] sm:$0xff] }
  0x5d   :  { %1006 = vmatpush3.bf16.msra.mxu0 %v1003_v21  ;;  %1034 = vmatpush3.bf16.msra.mxu1 %v1031_v32  ;;  %v1067_v14 = vpack.c.bf16 %v535_v13, %v534_v12  ;;  %v537_v16 = vld [vmem:[#allocation9 + $0x58] sm:$0xff]  ;;  %v538_v18 = vld [vmem:[#allocation9 + $0x60] sm:$0xff]  ;;  %v539_v19 = vld [vmem:[#allocation9 + $0x68] sm:$0xff] }
  0x5e   :  { %1008 = vmatprep.subr.bf16.mxu0 %v1007_v27  ;;  %1036 = vmatprep.subr.bf16.mxu1 %v1035_v38  ;;  %v1071_v17 = vpack.c.bf16 %v537_v16, %v536_v15  ;;  %v1075_v20 = vpack.c.bf16 %v539_v19, %v538_v18  ;;  %v540_v37 = vld [vmem:[#allocation9 + $0x70] sm:$0xff]  ;;  %v722_v40 = vld [vmem:[%s1356_s3] ss:$0 sm:$0xff]  ;;  %s1230_s3 = smov [#allocation11]  }
  0x5f   :  { %s708_s17 = sshll.u32 %s1230_s3, 4  ;;  %s709_s17 = int_to_ptr.vmem [resolvable:$true] %s708_s17 }
  0x60   :  { %s1194_s18 = scalar_lea.vmem %s709_s17, 2048  ;;  %p1199_p5 = scmp.lt.s32.totalorder %s709_s17, %s709_s17 }
  0x61   :  { %1010 = vmatpush3.bf16.msra.mxu0 %v1007_v27  ;;  %1038 = vmatpush3.bf16.msra.mxu1 %v1035_v38  ;;  %v541_v38 = vld [vmem:[#allocation9 + $0x78] sm:$0xff]  ;;  %p1195_p4 = scmp.ne.s32.totalorder %s709_s17, %s1194_s18  ;;  %p1200_p6 = scmp.lt.s32.totalorder %s1194_s18, %s1194_s18 }
  0x62   :  { %1012 = vmatprep.subr.bf16.mxu0 %v1011_v33  ;;  %1040 = vmatprep.subr.bf16.mxu1 %v1039_v42 }
  0x63   :  { %p1201_p7 = por %p1200_p6, %p1199_p5 }
  0x65   :  { %1014 = vmatpush3.bf16.msra.mxu0 %v1011_v33  ;;  %1042 = vmatpush3.bf16.msra.mxu1 %v1039_v42  ;;  %p1202_p8 = pnand %p1201_p7, %p1195_p4 }
  0x66   :  { %1016 = vmatprep.subr.bf16.mxu0 %v1015_v39  ;;  %1044 = vmatprep.subr.bf16.mxu1 %v1043_v46 }
  0x69   :  { %1018 = vmatpush3.bf16.msra.mxu0 %v1015_v39  ;;  %1046 = vmatpush3.bf16.msra.mxu1 %v1043_v46  ;;  %v1079_v39 = vpack.c.bf16 %v541_v38, %v540_v37 }
  0x6a   :  { %1048 = vmatprep.subr.bf16.mxu1 %v1047_v51  ;;  %1052 = vmatprep.subr.bf16.mxu0 %v1051_v3 }
  0x6c   :  { %852 = vmatmul.mubr.f32.vlgmr.msra.gmra.mrb[0].mxu0 %v131_v45 }
  0x6d   :  { %854 = vmatprep.mubr.f32.mxu0 %v132_v47  ;;  %1050 = vmatpush3.bf16.msra.mxu1 %v1047_v51 }
  0x6e   :  { %1083 = vmatprep.subr.bf16.mxu1 %v1051_v3  ;;  %1054 = vmatpush3.bf16.msra.mxu0 %v1051_v3 }
  0x6f   :  { %1056 = vmatprep.subr.bf16.mxu0 %v1055_v5 }
  0x70   :  { %855 = vmatmul.mubr.f32.gmra.mrb[2].mxu0 %v133_v50 }
  0x71   :  { %857 = vmatprep.mubr.f32.mxu0 %v134_v52 }
  0x72   :  { %1058 = vmatpush3.bf16.msra.mxu0 %v1055_v5 }
  0x73   :  { %1060 = vmatprep.subr.bf16.mxu0 %v1059_v8 }
  0x74   :  { %858 = vmatmul.mubr.f32.gmra.mrb[4].mxu0 %v135_v53 }
  0x75   :  { %860 = vmatprep.mubr.f32.mxu0 %v136_v54 }
  0x76   :  { %1062 = vmatpush3.bf16.msra.mxu0 %v1059_v8 }
  0x77   :  { %1064 = vmatprep.subr.bf16.mxu0 %v1063_v11 }
  0x78   :  { %861 = vmatmul.mubr.f32.gmra.mrb[6].mxu0 %v137_v55 }
  0x79   :  { %863 = vmatprep.mubr.f32.mxu0 %v138_v56 }
  0x7a   :  { %1066 = vmatpush3.bf16.msra.mxu0 %v1063_v11 }
  0x7b   :  { %1068 = vmatprep.subr.bf16.mxu0 %v1067_v14 }
  0x7c   :  { %864 = vmatmul.mubr.f32.gmra.mrb[8].mxu0 %v139_v57 }
  0x7d   :  { %866 = vmatprep.mubr.f32.mxu0 %v140_v58 }
  0x7e   :  { %1070 = vmatpush3.bf16.msra.mxu0 %v1067_v14 }
  0x7f   :  { %1072 = vmatprep.subr.bf16.mxu0 %v1071_v17 }
  0x80   :  { %867 = vmatmul.mubr.f32.gmra.mrb[10].mxu0 %v141_v59 }
  0x81   :  { %869 = vmatprep.mubr.f32.mxu0 %v142_v60 }
  0x82   :  { %1074 = vmatpush3.bf16.msra.mxu0 %v1071_v17 }
  0x83   :  { %1076 = vmatprep.subr.bf16.mxu0 %v1075_v20 }
  0x84   :  { %870 = vmatmul.mubr.f32.gmra.mrb[12].mxu0 %v143_v61 }
  0x85   :  { %872 = vmatprep.mubr.f32.mxu0 %v144_v62 }
  0x86   :  { %1078 = vmatpush3.bf16.msra.mxu0 %v1075_v20 }
  0x87   :  { %1080 = vmatprep.subr.bf16.mxu0 %v1079_v39 }
  0x88   :  { %873 = vmatmul.mubr.f32.gmra.mrb[14].mxu0 %v145_v63 }
  0x8a   :  { %1082 = vmatpush3.bf16.msra.mxu0 %v1079_v39 }
 0x13f   :  { %v853_v21 = vpop.f32.mrb[0].mxu0 }
 0x140   :  { %v212_v22 = vpop.f32.mrb[1].mxu0 }
 0x141   :  { %907 = vmatprep.mubr.f32.mxu1 %v212_v22 }
 0x142   :  { %908 = vmatmul.mubr.f32.vlgmr.msra.gmra.mrb[0].mxu1 %v853_v21 }
 0x143   :  { %v856_v23 = vpop.f32.mrb[2].mxu0  ;;  %1091 = vmatpush3.bf16.msra.mxu1 %v1051_v3 }
 0x144   :  { %v222_v24 = vpop.f32.mrb[3].mxu0  ;;  %1084 = vmatprep.subr.bf16.mxu1 %v1055_v5 }
 0x145   :  { %910 = vmatprep.mubr.f32.mxu1 %v222_v24 }
 0x146   :  { %911 = vmatmul.mubr.f32.gmra.mrb[2].mxu1 %v856_v23 }
 0x147   :  { %v859_v25 = vpop.f32.mrb[4].mxu0  ;;  %1092 = vmatpush3.bf16.msra.mxu1 %v1055_v5 }
 0x148   :  { %v232_v26 = vpop.f32.mrb[5].mxu0  ;;  %1085 = vmatprep.subr.bf16.mxu1 %v1059_v8 }
 0x149   :  { %913 = vmatprep.mubr.f32.mxu1 %v232_v26 }
 0x14a   :  { %914 = vmatmul.mubr.f32.gmra.mrb[4].mxu1 %v859_v25 }
 0x14b   :  { %v862_v27 = vpop.f32.mrb[6].mxu0  ;;  %1093 = vmatpush3.bf16.msra.mxu1 %v1059_v8 }
 0x14c   :  { %v242_v28 = vpop.f32.mrb[7].mxu0  ;;  %1086 = vmatprep.subr.bf16.mxu1 %v1063_v11 }
 0x14d   :  { %916 = vmatprep.mubr.f32.mxu1 %v242_v28 }
 0x14e   :  { %917 = vmatmul.mubr.f32.gmra.mrb[6].mxu1 %v862_v27 }
 0x14f   :  { %v865_v29 = vpop.f32.mrb[8].mxu0  ;;  %1094 = vmatpush3.bf16.msra.mxu1 %v1063_v11 }
 0x150   :  { %v252_v30 = vpop.f32.mrb[9].mxu0  ;;  %1087 = vmatprep.subr.bf16.mxu1 %v1067_v14 }
 0x151   :  { %919 = vmatprep.mubr.f32.mxu1 %v252_v30 }
 0x152   :  { %920 = vmatmul.mubr.f32.gmra.mrb[8].mxu1 %v865_v29 }
 0x153   :  { %v868_v31 = vpop.f32.mrb[10].mxu0  ;;  %1095 = vmatpush3.bf16.msra.mxu1 %v1067_v14 }
 0x154   :  { %v262_v32 = vpop.f32.mrb[11].mxu0  ;;  %1088 = vmatprep.subr.bf16.mxu1 %v1071_v17 }
 0x155   :  { %922 = vmatprep.mubr.f32.mxu1 %v262_v32 }
 0x156   :  { %923 = vmatmul.mubr.f32.gmra.mrb[10].mxu1 %v868_v31 }
 0x157   :  { %v871_v33 = vpop.f32.mrb[12].mxu0  ;;  %1096 = vmatpush3.bf16.msra.mxu1 %v1071_v17 }
 0x158   :  { %v272_v34 = vpop.f32.mrb[13].mxu0  ;;  %1089 = vmatprep.subr.bf16.mxu1 %v1075_v20 }
 0x159   :  { %925 = vmatprep.mubr.f32.mxu1 %v272_v34 }
 0x15a   :  { %926 = vmatmul.mubr.f32.gmra.mrb[12].mxu1 %v871_v33 }
 0x15b   :  { %v874_v35 = vpop.f32.mrb[14].mxu0  ;;  %1097 = vmatpush3.bf16.msra.mxu1 %v1075_v20 }
 0x15c   :  { %v282_v36 = vpop.f32.mrb[15].mxu0  ;;  %1090 = vmatprep.subr.bf16.mxu1 %v1079_v39 }
 0x15d   :  { %928 = vmatprep.mubr.f32.mxu1 %v282_v36 }
 0x15e   :  { %929 = vmatmul.mubr.f32.gmra.mrb[14].mxu1 %v874_v35 }
 0x15f   :  { %1098 = vmatpush3.bf16.msra.mxu1 %v1079_v39 }
 0x215   :  { %v909_v41 = vpop.f32.mrb[0].mxu1 }
 0x216   :  { %v437_v42 = vadd.f32 %v909_v41, %v722_v40  ;;  %v431_v43 = vpop.f32.mrb[1].mxu1 }
 0x217   :  { %v432_v44 = vadd.f32 %v722_v40, %v431_v43 }
 0x218   :  { %v511_v47 = vmax.f32 %v437_v42, 0.0 }
 0x219   :  { %v510_v45 = vmax.f32 %v432_v44, 0.0  ;;  %v912_v46 = vpop.f32.mrb[2].mxu1 }
 0x21a   :  { %v447_v48 = vadd.f32 %v912_v46, %v722_v40  ;;  %v441_v49 = vpop.f32.mrb[3].mxu1 }
 0x21b   :  { %v442_v50 = vadd.f32 %v722_v40, %v441_v49  ;;  %963 = vmatprep.mubr.f32.mxu0 %v510_v45 }
 0x21c   :  { %964 = vmatmul.mubr.f32.vlgmr.msra.gmra.mrb[16].mxu0 %v511_v47  ;;  %v513_v53 = vmax.f32 %v447_v48, 0.0 }
 0x21d   :  { %v512_v51 = vmax.f32 %v442_v50, 0.0  ;;  %v915_v52 = vpop.f32.mrb[4].mxu1 }
 0x21e   :  { %v457_v54 = vadd.f32 %v915_v52, %v722_v40  ;;  %v451_v55 = vpop.f32.mrb[5].mxu1 }
 0x21f   :  { %v452_v56 = vadd.f32 %v722_v40, %v451_v55  ;;  %966 = vmatprep.mubr.f32.mxu0 %v512_v51 }
 0x220   :  { %967 = vmatmul.mubr.f32.gmra.mrb[18].mxu0 %v513_v53  ;;  %v515_v59 = vmax.f32 %v457_v54, 0.0 }
 0x221   :  { %v514_v57 = vmax.f32 %v452_v56, 0.0  ;;  %v918_v58 = vpop.f32.mrb[6].mxu1 }
 0x222   :  { %v467_v60 = vadd.f32 %v918_v58, %v722_v40  ;;  %v461_v61 = vpop.f32.mrb[7].mxu1 }
 0x223   :  { %v462_v62 = vadd.f32 %v722_v40, %v461_v61  ;;  %969 = vmatprep.mubr.f32.mxu0 %v514_v57 }
 0x224   :  { %970 = vmatmul.mubr.f32.gmra.mrb[20].mxu0 %v515_v59  ;;  %v517_v1 = vmax.f32 %v467_v60, 0.0 }
 0x225   :  { %v516_v63 = vmax.f32 %v462_v62, 0.0  ;;  %v921_v0 = vpop.f32.mrb[8].mxu1 }
 0x226   :  { %v477_v2 = vadd.f32 %v921_v0, %v722_v40  ;;  %v471_v3 = vpop.f32.mrb[9].mxu1 }
 0x227   :  { %v472_v4 = vadd.f32 %v722_v40, %v471_v3  ;;  %972 = vmatprep.mubr.f32.mxu0 %v516_v63 }
 0x228   :  { %973 = vmatmul.mubr.f32.gmra.mrb[22].mxu0 %v517_v1  ;;  %v519_v7 = vmax.f32 %v477_v2, 0.0 }
 0x229   :  { %v518_v5 = vmax.f32 %v472_v4, 0.0  ;;  %v924_v6 = vpop.f32.mrb[10].mxu1 }
 0x22a   :  { %v487_v8 = vadd.f32 %v924_v6, %v722_v40  ;;  %v481_v9 = vpop.f32.mrb[11].mxu1 }
 0x22b   :  { %v482_v10 = vadd.f32 %v722_v40, %v481_v9  ;;  %975 = vmatprep.mubr.f32.mxu1 %v518_v5 }
 0x22c   :  { %976 = vmatmul.mubr.f32.vlgmr.msra.gmra.mrb[16].mxu1 %v519_v7  ;;  %v521_v13 = vmax.f32 %v487_v8, 0.0 }
 0x22d   :  { %v520_v11 = vmax.f32 %v482_v10, 0.0  ;;  %v927_v12 = vpop.f32.mrb[12].mxu1 }
 0x22e   :  { %v497_v14 = vadd.f32 %v927_v12, %v722_v40  ;;  %v491_v15 = vpop.f32.mrb[13].mxu1 }
 0x22f   :  { %v492_v16 = vadd.f32 %v722_v40, %v491_v15  ;;  %978 = vmatprep.mubr.f32.mxu1 %v520_v11 }
 0x230   :  { %979 = vmatmul.mubr.f32.gmra.mrb[18].mxu1 %v521_v13  ;;  %v523_v19 = vmax.f32 %v497_v14, 0.0 }
 0x231   :  { %v522_v17 = vmax.f32 %v492_v16, 0.0  ;;  %v930_v18 = vpop.f32.mrb[14].mxu1 }
 0x232   :  { %v507_v20 = vadd.f32 %v930_v18, %v722_v40  ;;  %v501_v21 = vpop.f32.mrb[15].mxu1 }
 0x233   :  { %v502_v22 = vadd.f32 %v722_v40, %v501_v21  ;;  %981 = vmatprep.mubr.f32.mxu1 %v522_v17 }
 0x234   :  { %982 = vmatmul.mubr.f32.gmra.mrb[20].mxu1 %v523_v19  ;;  %v525_v24 = vmax.f32 %v507_v20, 0.0 }
 0x235   :  { %v524_v23 = vmax.f32 %v502_v22, 0.0 }
 0x237   :  { %984 = vmatprep.mubr.f32.mxu1 %v524_v23 }
 0x238   :  { %985 = vmatmul.mubr.f32.gmra.mrb[22].mxu1 %v525_v24 }
 0x2ef   :  { %v965_v25 = vpop.f32.mrb[16].mxu0 }
 0x2f0   :  { %688 = vst [vmem:[#allocation11 + $0x8] sm:$0xff] %v965_v25  ;;  %v608_v26 = vpop.f32.mrb[17].mxu0 }
 0x2f1   :  { %687 = vst [vmem:[#allocation11] sm:$0xff] %v608_v26 }
 0x2f3   :  { %v968_v27 = vpop.f32.mrb[18].mxu0 }
 0x2f4   :  { %690 = vst [vmem:[#allocation11 + $0x18] sm:$0xff] %v968_v27  ;;  %v618_v28 = vpop.f32.mrb[19].mxu0 }
 0x2f5   :  { %689 = vst [vmem:[#allocation11 + $0x10] sm:$0xff] %v618_v28 }
 0x2f7   :  { %v971_v29 = vpop.f32.mrb[20].mxu0 }
 0x2f8   :  { %692 = vst [vmem:[#allocation11 + $0x28] sm:$0xff] %v971_v29  ;;  %v628_v30 = vpop.f32.mrb[21].mxu0 }
 0x2f9   :  { %691 = vst [vmem:[#allocation11 + $0x20] sm:$0xff] %v628_v30 }
 0x2fb   :  { %v974_v31 = vpop.f32.mrb[22].mxu0 }
 0x2fc   :  { %694 = vst [vmem:[#allocation11 + $0x38] sm:$0xff] %v974_v31  ;;  %v638_v32 = vpop.f32.mrb[23].mxu0 }
 0x2fd   :  { %693 = vst [vmem:[#allocation11 + $0x30] sm:$0xff] %v638_v32 }
 0x2ff   :  { %v977_v33 = vpop.f32.mrb[16].mxu1 }
 0x300   :  { %696 = vst [vmem:[#allocation11 + $0x48] sm:$0xff] %v977_v33  ;;  %v648_v34 = vpop.f32.mrb[17].mxu1 }
 0x301   :  { %695 = vst [vmem:[#allocation11 + $0x40] sm:$0xff] %v648_v34 }
 0x303   :  { %v980_v35 = vpop.f32.mrb[18].mxu1 }
 0x304   :  { %698 = vst [vmem:[#allocation11 + $0x58] sm:$0xff] %v980_v35  ;;  %v658_v36 = vpop.f32.mrb[19].mxu1 }
 0x305   :  { %697 = vst [vmem:[#allocation11 + $0x50] sm:$0xff] %v658_v36 }
 0x307   :  { %v983_v37 = vpop.f32.mrb[20].mxu1 }
 0x308   :  { %700 = vst [vmem:[#allocation11 + $0x68] sm:$0xff] %v983_v37  ;;  %v668_v38 = vpop.f32.mrb[21].mxu1 }
 0x309   :  { %699 = vst [vmem:[#allocation11 + $0x60] sm:$0xff] %v668_v38 }
 0x30b   :  { %v986_v39 = vpop.f32.mrb[22].mxu1 }
 0x30c   :  { %702 = vst [vmem:[#allocation11 + $0x78] sm:$0xff] %v986_v39  ;;  %v678_v40 = vpop.f32.mrb[23].mxu1 }
 0x30d   :  { %701 = vst [vmem:[#allocation11 + $0x70] sm:$0xff] %v678_v40 }
 0x30e   :  { %1205 = shalt.err (!%p1202_p8)
}
 0x30f   :  { %s1206_s22 = scalar_lea.hbm %s1358_s5, 2048 }
 0x310   :  { %p1207_p9 = scmp.ne.s32.totalorder %s1358_s5, %s1206_s22  ;;  %p1210_p10 = scmp.lt.u32.totalorder %s1206_s22, %s1358_s5 }
 0x312   :  { %p1212_p11 = pnand %p1210_p10, %p1207_p9 }
 0x314   :  { %1215 = shalt.err (!%p1212_p11)
}
 0x315   :  { %714 = dma.vmem_to_hbm [thread:$0]  %s709_s17, 2048, %s1358_s5, [#allocation5], %s1226_s30, %s1226_s30, %s1227_s6  }
 0x316   :  { %1222 = dma.done.wait [#allocation5], 2048  }
 0x317   :  { %1223 = vsyncadd [#allocation5], 4294965248 }
 0x318   :  { %718 = vsyncpa [#allocation4], 1 }
 0x319   :  { %719 = vsyncpa [#allocation7], 1 }
 0x31a   :  { %720 = vsyncpa [#allocation10], 1 }
 0x31b   :  { %721 = vsyncpa [#allocation5], 1 }

</bundles_post_ra>
